<compile_context>
chip_gen: v7x
topology: tpu7x:2x2x1
jax: 0.10.0
libtpu: 0.0.40
codegen_flags: <defaults>
</compile_context>

<pallas_src>
import numpy as np
import jax
import jax.numpy as jnp
from jax.experimental import pallas as pl
from jax.experimental.pallas import tpu as pltpu

NEG_SLOPE = 0.01  # nn.LeakyReLU default


def _lrelu(x):
    return jnp.where(x >= 0, x, NEG_SLOPE * x)


def _make_kernel(n_other):
    """n_other = num_elements - 1 (agent 0 never attends over itself)."""

    def kernel(sa_ref, smm_ref,
               enc_w_ref, enc_b_ref,
               smm_w_ref, smm_b_ref,
               sel_w_ref, kv_w_ref, val_b_ref,
               seg_sum_ref, seg_bcast_ref,
               fc1a_ref, fc1b_ref, fc1_b_ref, fc2_w_ref, fc2_b_ref,
               q_ref):
        f32 = jnp.float32

        # Fused state || meanfield || meanfield2 encoder (block-diagonal weight).
        # Output is already the lane-packed [s_enc | mf_enc | mf2_enc] slab (tb, 3H).
        smm_enc = _lrelu(jnp.dot(smm_ref[...], smm_w_ref[...],
                                 preferred_element_type=f32) + smm_b_ref[...])

        # All-head selector projection in one matmul.  The (3H, H) weight is zero on the
        # mf/mf2 rows so only s_enc lanes contribute; 1/sqrt(attend_dim) is folded in.
        sel = jnp.dot(smm_enc, sel_w_ref[...], preferred_element_type=f32)     # (tb, H)

        key_w = kv_w_ref[0]                    # (H, H)  all heads fused, head hh in lanes hh*D:(hh+1)*D
        val_w = kv_w_ref[1]                    # (H, H)
        val_b = val_b_ref[...]                 # (1, H)
        seg_sum = seg_sum_ref[...]             # (H, HH) 0/1 block matrix: segmented lane reduce
        seg_bcast = seg_bcast_ref[...]         # (HH, H) 0/1 block matrix: per-head lane broadcast

        scaled = []
        vals = []
        for e in range(n_other):
            # Per-element critic encoder (weights differ per element -> small loop).
            o = _lrelu(jnp.dot(sa_ref[e], enc_w_ref[e],
                               preferred_element_type=f32) + enc_b_ref[e])     # (tb, H)
            k = jnp.dot(o, key_w, preferred_element_type=f32)                  # (tb, H) all heads
            v = _lrelu(jnp.dot(o, val_w, preferred_element_type=f32) + val_b)  # (tb, H) all heads
            # scaled attention logits for every head at once: (tb, HH)
            scaled.append(jnp.dot(sel * k, seg_sum, preferred_element_type=f32))
            vals.append(v)

        # Softmax over the "other elements" axis (list index), all heads simultaneously.
        m = scaled[0]
        for e in range(1, n_other):
            m = jnp.maximum(m, scaled[e])
        ex = [jnp.exp(s - m) for s in scaled]
        denom = ex[0]
        for e in range(1, n_other):
            denom = denom + ex[e]
        inv = pl.reciprocal(denom, approx=True)                                # (tb, HH)

        # Weighted value sum -> lane-packed head outputs [head_0 | ... | head_{HH-1}].
        heads = None
        for e in range(n_other):
            w_full = jnp.dot(ex[e] * inv, seg_bcast, preferred_element_type=f32)  # (tb, H)
            t = w_full * vals[e]
            heads = t if heads is None else heads + t                             # (tb, H)

        # Critic MLP.  critic_in = [smm_enc | heads]; concatenate avoided by splitting fc1.
        h1 = _lrelu(jnp.dot(smm_enc, fc1a_ref[...], preferred_element_type=f32)
                    + jnp.dot(heads, fc1b_ref[...], preferred_element_type=f32)
                    + fc1_b_ref[...])
        q_ref[...] = jnp.dot(h1, fc2_w_ref[...], preferred_element_type=f32) + fc2_b_ref[...]

    return kernel


def prepare_params(params):
    """One-time host-side repack of module parameters into fused / lane-packed slabs."""
    HH, H, D = params["key_w"].shape
    K = HH * D
    assert K == H, "hidden_dim must equal attend_heads * attend_dim"
    sd = params["s_w"].shape[0]
    ad = params["mf_w"].shape[0]
    ad2 = params["mf2_w"].shape[0]

    def fuse_heads(w):                       # (HH, H, D) -> (H, HH*D), head hh in cols hh*D:(hh+1)*D
        return jnp.transpose(w, (1, 0, 2)).reshape(H, K)

    key_w_f = fuse_heads(params["key_w"])
    val_w_f = fuse_heads(params["val_w"])
    sel_w_f = fuse_heads(params["sel_w"]) * jnp.float32(1.0 / np.sqrt(D))  # fold attention scale
    val_b_f = jnp.transpose(params["val_b"], (1, 0, 2)).reshape(1, K)

    # Block-diagonal fused encoder for [state | meanfield | meanfield2].
    smm_dim = sd + ad + ad2
    smm_w = jnp.zeros((smm_dim, 3 * H), jnp.float32)
    smm_w = smm_w.at[:sd, :H].set(params["s_w"])
    smm_w = smm_w.at[sd:sd + ad, H:2 * H].set(params["mf_w"])
    smm_w = smm_w.at[sd + ad:, 2 * H:].set(params["mf2_w"])
    smm_b = jnp.concatenate([params["s_b"], params["mf_b"], params["mf2_b"]], axis=1)

    # Selector weight padded to read the s_enc lanes of the fused smm encoding.
    sel_w_pad = jnp.zeros((3 * H, K), jnp.float32).at[:H].set(sel_w_f)

    # 0/1 segment matrices: seg_sum reduces each head's D lanes, seg_bcast broadcasts
    # each head weight back over its D lanes (both ride the otherwise-idle MXU).
    seg = (np.arange(K)[:, None] // D == np.arange(HH)[None, :]).astype(np.float32)
    seg_sum = jnp.asarray(seg)               # (K, HH)
    seg_bcast = jnp.asarray(seg.T)           # (HH, K)

    fc1 = params["fc1_w"]                    # (4H, H)
    return dict(
        enc_w_o=params["enc_w"][1:],         # drop dead element-0 encoder
        enc_b_o=params["enc_b"][1:],
        smm_w=smm_w, smm_b=smm_b,
        sel_w_pad=sel_w_pad,
        kv_w=jnp.stack([key_w_f, val_w_f], axis=0),
        val_b_f=val_b_f,
        seg_sum=seg_sum, seg_bcast=seg_bcast,
        fc1a_w=fc1[:3 * H], fc1b_w=fc1[3 * H:],
        fc1_b=params["fc1_b"], fc2_w=params["fc2_w"], fc2_b=params["fc2_b"],
    )


def mtmfaaac_forward(fused, sa_stacked, state_agent, meanfield, meanfield2):
    B = state_agent.shape[0]
    sa_others = sa_stacked[1:]               # agent 0's own encoding is never consumed
    smm_in = jnp.concatenate([state_agent, meanfield, meanfield2], axis=1)

    n_other, _, idim = sa_others.shape
    smm_dim = smm_in.shape[1]
    odim = fused["fc2_w"].shape[1]

    # Batch tile: largest friendly multiple of 8 that divides B (grid of 1 for toy B).
    tb = B
    for cand in (512, 256, 128, 64, 32, 16, 8):
        if B % cand == 0:
            tb = cand
            break
    grid = (B // tb,)

    def resident(a):                          # weights: same block every step -> stay in VMEM
        nd = a.ndim
        return pl.BlockSpec(a.shape, lambda i, nd=nd: (0,) * nd)

    args = (sa_others, smm_in,
            fused["enc_w_o"], fused["enc_b_o"],
            fused["smm_w"], fused["smm_b"],
            fused["sel_w_pad"], fused["kv_w"], fused["val_b_f"],
            fused["seg_sum"], fused["seg_bcast"],
            fused["fc1a_w"], fused["fc1b_w"], fused["fc1_b"],
            fused["fc2_w"], fused["fc2_b"])

    in_specs = ([pl.BlockSpec((n_other, tb, idim), lambda i: (0, i, 0)),
                 pl.BlockSpec((tb, smm_dim), lambda i: (i, 0))]
                + [resident(a) for a in args[2:]])

    return pl.pallas_call(
        _make_kernel(n_other),
        out_shape=jax.ShapeDtypeStruct((B, odim), jnp.float32),
        grid=grid,
        in_specs=in_specs,
        out_specs=pl.BlockSpec((tb, odim), lambda i: (i, 0)),
        compiler_params=pltpu.CompilerParams(dimension_semantics=("parallel",)),
    )(*args)


def _reference(params, sa_stacked, state_agent, meanfield, meanfield2,
               *, num_elements, attend_heads, attend_dim):
    """Pure-JAX mirror of the PyTorch forward (default arg path) for checking."""
    sa_encs = [_lrelu(sa_stacked[e] @ params["enc_w"][e] + params["enc_b"][e])
               for e in range(num_elements)]
    s_enc = _lrelu(state_agent @ params["s_w"] + params["s_b"])
    mf_enc = _lrelu(meanfield @ params["mf_w"] + params["mf_b"])
    mf2_enc = _lrelu(meanfield2 @ params["mf2_w"] + params["mf2_b"])
    head_outs = []
    for hh in range(attend_heads):
        sel = s_enc @ params["sel_w"][hh]
        keys = jnp.stack([o @ params["key_w"][hh] for o in sa_encs[1:]], 0)        # (E-1,B,D)
        vals = jnp.stack([_lrelu(o @ params["val_w"][hh] + params["val_b"][hh])
                          for o in sa_encs[1:]], 0)
        logits = jnp.einsum("bd,ebd->be", sel, keys) / np.sqrt(attend_dim)
        w = jax.nn.softmax(logits, axis=1)
        head_outs.append(jnp.einsum("be,ebd->bd", w, vals))
    critic_in = jnp.concatenate([s_enc, mf_enc, mf2_enc] + head_outs, axis=1)
    h1 = _lrelu(critic_in @ params["fc1_w"] + params["fc1_b"])
    return h1 @ params["fc2_w"] + params["fc2_b"]


def init_params(key, *, observation_space, action_space, state_dim, action_dim,
                action_dim2, hidden_dim, attend_heads):
    """Deterministic synthetic parameters (shapes match the module's __init__)."""
    attend_dim = hidden_dim // attend_heads
    E = len(observation_space)
    idim = observation_space[0] + action_space[0]  # all elements share idim here
    ks = jax.random.split(key, 16)

    def w(k, shape, scale=0.1):
        return (scale * jax.random.normal(k, shape)).astype(jnp.float32)

    return dict(
        enc_w=w(ks[0], (E, idim, hidden_dim)),
        enc_b=w(ks[1], (E, 1, hidden_dim)),
        s_w=w(ks[2], (state_dim, hidden_dim)),
        s_b=w(ks[3], (1, hidden_dim)),
        mf_w=w(ks[4], (action_dim, hidden_dim)),
        mf_b=w(ks[5], (1, hidden_dim)),
        mf2_w=w(ks[6], (action_dim2, hidden_dim)),
        mf2_b=w(ks[7], (1, hidden_dim)),
        key_w=w(ks[8], (attend_heads, hidden_dim, attend_dim)),
        sel_w=w(ks[9], (attend_heads, hidden_dim, attend_dim)),
        val_w=w(ks[10], (attend_heads, hidden_dim, attend_dim)),
        val_b=w(ks[11], (attend_heads, 1, attend_dim)),
        fc1_w=w(ks[12], (4 * hidden_dim, hidden_dim)),
        fc1_b=w(ks[13], (1, hidden_dim)),
        fc2_w=w(ks[14], (hidden_dim, action_dim)),
        fc2_b=w(ks[15], (1, action_dim)),
    )


if __name__ == "__main__":
    # Small configuration consistent with the module.
    batch_size = 8
    state_dim = 16
    action_dim = 4          # odim
    action_dim2 = 4         # odim2
    hidden_dim = 32
    attend_heads = 4
    attend_dim = hidden_dim // attend_heads
    num_elements = 3
    observation_space = [8] * num_elements
    action_space = [4] * num_elements
    idim = observation_space[0] + action_space[0]

    key = jax.random.PRNGKey(0)
    kp, k1, k2, k3, k4 = jax.random.split(key, 5)
    params = init_params(kp, observation_space=observation_space,
                         action_space=action_space, state_dim=state_dim,
                         action_dim=action_dim, action_dim2=action_dim2,
                         hidden_dim=hidden_dim, attend_heads=attend_heads)
    fused = prepare_params(params)

    # Glue that mirrors the torch forward's list shuffling / concat:
    # new_inps[i] = cat(obs_i, act_i) of shape (batch, obs_i + act_i); stacked to (E, B, idim).
    sa_stacked = jax.random.normal(k1, (num_elements, batch_size, idim), dtype=jnp.float32)
    state_agent = jax.random.normal(k2, (batch_size, state_dim), dtype=jnp.float32)
    meanfield = jax.random.normal(k3, (batch_size, action_dim), dtype=jnp.float32)
    meanfield2 = jax.random.normal(k4, (batch_size, action_dim2), dtype=jnp.float32)

    q = mtmfaaac_forward(fused, sa_stacked, state_agent, meanfield, meanfield2)
    q = jax.block_until_ready(q)

    ref = _reference(params, sa_stacked, state_agent, meanfield, meanfield2,
                     num_elements=num_elements, attend_heads=attend_heads,
                     attend_dim=attend_dim)
    assert q.shape == (batch_size, action_dim)
    # atol/rtol loosened slightly for pl.reciprocal(approx=True) in the softmax.
    np.testing.assert_allclose(np.asarray(q), np.asarray(ref), rtol=2e-2, atol=2e-3)

    # TODO(synk): logger/TensorBoard entropy logging and the return_q / regularize /
    # return_attend branches are host-side bookkeeping outside the default forward path.
    print("KERNEL_OK")
</pallas_src>

<mosaic_0001>
module attributes {stable_mosaic.version = 11 : i64} {
  func.func @kernel(%arg0: i32, %arg1: memref<2x8x12xf32, #tpu.memory_space<vmem>>, %arg2: memref<8x24xf32, #tpu.memory_space<vmem>>, %arg3: memref<2x12x32xf32, #tpu.memory_space<vmem>>, %arg4: memref<2x1x32xf32, #tpu.memory_space<vmem>>, %arg5: memref<24x96xf32, #tpu.memory_space<vmem>>, %arg6: memref<1x96xf32, #tpu.memory_space<vmem>>, %arg7: memref<96x32xf32, #tpu.memory_space<vmem>>, %arg8: memref<2x32x32xf32, #tpu.memory_space<vmem>>, %arg9: memref<1x32xf32, #tpu.memory_space<vmem>>, %arg10: memref<32x4xf32, #tpu.memory_space<vmem>>, %arg11: memref<4x32xf32, #tpu.memory_space<vmem>>, %arg12: memref<96x32xf32, #tpu.memory_space<vmem>>, %arg13: memref<32x32xf32, #tpu.memory_space<vmem>>, %arg14: memref<1x32xf32, #tpu.memory_space<vmem>>, %arg15: memref<32x4xf32, #tpu.memory_space<vmem>>, %arg16: memref<1x4xf32, #tpu.memory_space<vmem>>, %arg17: memref<8x4xf32, #tpu.memory_space<vmem>>) attributes {dimension_semantics = [#tpu.dimension_semantics<parallel>], iteration_bounds = array<i64: 1>, scalar_prefetch = 0 : i64, scratch_operands = 0 : i64, tpu.core_type = #tpu.core_type<tc>, window_params = [{transform_indices = @transform_0, window_bounds = array<i64: 2, 8, 12>}, {transform_indices = @transform_1, window_bounds = array<i64: 8, 24>}, {pipeline_mode = #tpu.pipeline_mode<synchronous>, transform_indices = @transform_2, window_bounds = array<i64: 2, 12, 32>}, {pipeline_mode = #tpu.pipeline_mode<synchronous>, transform_indices = @transform_3, window_bounds = array<i64: 2, 1, 32>}, {pipeline_mode = #tpu.pipeline_mode<synchronous>, transform_indices = @transform_4, window_bounds = array<i64: 24, 96>}, {pipeline_mode = #tpu.pipeline_mode<synchronous>, transform_indices = @transform_5, window_bounds = array<i64: 1, 96>}, {pipeline_mode = #tpu.pipeline_mode<synchronous>, transform_indices = @transform_6, window_bounds = array<i64: 96, 32>}, {pipeline_mode = #tpu.pipeline_mode<synchronous>, transform_indices = @transform_7, window_bounds = array<i64: 2, 32, 32>}, {pipeline_mode = #tpu.pipeline_mode<synchronous>, transform_indices = @transform_8, window_bounds = array<i64: 1, 32>}, {pipeline_mode = #tpu.pipeline_mode<synchronous>, transform_indices = @transform_9, window_bounds = array<i64: 32, 4>}, {pipeline_mode = #tpu.pipeline_mode<synchronous>, transform_indices = @transform_10, window_bounds = array<i64: 4, 32>}, {pipeline_mode = #tpu.pipeline_mode<synchronous>, transform_indices = @transform_11, window_bounds = array<i64: 96, 32>}, {pipeline_mode = #tpu.pipeline_mode<synchronous>, transform_indices = @transform_12, window_bounds = array<i64: 32, 32>}, {pipeline_mode = #tpu.pipeline_mode<synchronous>, transform_indices = @transform_13, window_bounds = array<i64: 1, 32>}, {pipeline_mode = #tpu.pipeline_mode<synchronous>, transform_indices = @transform_14, window_bounds = array<i64: 32, 4>}, {pipeline_mode = #tpu.pipeline_mode<synchronous>, transform_indices = @transform_15, window_bounds = array<i64: 1, 4>}, {transform_indices = @transform_16, window_bounds = array<i64: 8, 4>}]} {
    %c0 = arith.constant 0 : index
    %c0_0 = arith.constant 0 : index
    %0 = vector.load %arg2[%c0, %c0_0] : memref<8x24xf32, #tpu.memory_space<vmem>>, vector<8x24xf32>
    %c0_1 = arith.constant 0 : index
    %c0_2 = arith.constant 0 : index
    %1 = vector.load %arg5[%c0_1, %c0_2] : memref<24x96xf32, #tpu.memory_space<vmem>>, vector<24x96xf32>
    %cst = arith.constant dense<0.000000e+00> : vector<8x96xf32>
    %2 = tpu.matmul %0, %1, %cst {dimension_numbers = #tpu.dot_dimension_numbers<[1], [0], [0], [1], [0, 0, 1, 1], [], []>} : vector<8x24xf32>, vector<24x96xf32>, vector<8x96xf32> -> vector<8x96xf32>
    %c0_3 = arith.constant 0 : index
    %c0_4 = arith.constant 0 : index
    %3 = vector.load %arg6[%c0_3, %c0_4] : memref<1x96xf32, #tpu.memory_space<vmem>>, vector<1x96xf32>
    %4 = vector.broadcast %3 : vector<1x96xf32> to vector<8x96xf32>
    %5 = arith.addf %2, %4 : vector<8x96xf32>
    %cst_5 = arith.constant 0.000000e+00 : f32
    %6 = vector.broadcast %cst_5 : f32 to vector<8x96xf32>
    %7 = arith.cmpf oge, %5, %6 : vector<8x96xf32>
    %cst_6 = arith.constant 0.00999999977 : f32
    %8 = vector.broadcast %cst_6 : f32 to vector<8x96xf32>
    %9 = arith.mulf %8, %5 : vector<8x96xf32>
    %10 = arith.select %7, %5, %9 : vector<8x96xi1>, vector<8x96xf32>
    %c0_7 = arith.constant 0 : index
    %c0_8 = arith.constant 0 : index
    %11 = vector.load %arg7[%c0_7, %c0_8] : memref<96x32xf32, #tpu.memory_space<vmem>>, vector<96x32xf32>
    %cst_9 = arith.constant dense<0.000000e+00> : vector<8x32xf32>
    %12 = tpu.matmul %10, %11, %cst_9 {dimension_numbers = #tpu.dot_dimension_numbers<[1], [0], [0], [1], [0, 0, 1, 1], [], []>} : vector<8x96xf32>, vector<96x32xf32>, vector<8x32xf32> -> vector<8x32xf32>
    %c0_10 = arith.constant 0 : index
    %c0_11 = arith.constant 0 : index
    %c0_12 = arith.constant 0 : index
    %13 = vector.load %arg8[%c0_10, %c0_11, %c0_12] : memref<2x32x32xf32, #tpu.memory_space<vmem>>, vector<1x32x32xf32>
    %14 = vector.shape_cast %13 : vector<1x32x32xf32> to vector<32x32xf32>
    %c1 = arith.constant 1 : index
    %c0_13 = arith.constant 0 : index
    %c0_14 = arith.constant 0 : index
    %15 = vector.load %arg8[%c1, %c0_13, %c0_14] : memref<2x32x32xf32, #tpu.memory_space<vmem>>, vector<1x32x32xf32>
    %16 = vector.shape_cast %15 : vector<1x32x32xf32> to vector<32x32xf32>
    %c0_15 = arith.constant 0 : index
    %c0_16 = arith.constant 0 : index
    %17 = vector.load %arg9[%c0_15, %c0_16] : memref<1x32xf32, #tpu.memory_space<vmem>>, vector<1x32xf32>
    %c0_17 = arith.constant 0 : index
    %c0_18 = arith.constant 0 : index
    %18 = vector.load %arg10[%c0_17, %c0_18] : memref<32x4xf32, #tpu.memory_space<vmem>>, vector<32x4xf32>
    %c0_19 = arith.constant 0 : index
    %c0_20 = arith.constant 0 : index
    %19 = vector.load %arg11[%c0_19, %c0_20] : memref<4x32xf32, #tpu.memory_space<vmem>>, vector<4x32xf32>
    %c0_21 = arith.constant 0 : index
    %c0_22 = arith.constant 0 : index
    %c0_23 = arith.constant 0 : index
    %20 = vector.load %arg1[%c0_21, %c0_22, %c0_23] : memref<2x8x12xf32, #tpu.memory_space<vmem>>, vector<1x8x12xf32>
    %21 = vector.shape_cast %20 : vector<1x8x12xf32> to vector<8x12xf32>
    %c0_24 = arith.constant 0 : index
    %c0_25 = arith.constant 0 : index
    %c0_26 = arith.constant 0 : index
    %22 = vector.load %arg3[%c0_24, %c0_25, %c0_26] : memref<2x12x32xf32, #tpu.memory_space<vmem>>, vector<1x12x32xf32>
    %23 = vector.shape_cast %22 : vector<1x12x32xf32> to vector<12x32xf32>
    %cst_27 = arith.constant dense<0.000000e+00> : vector<8x32xf32>
    %24 = tpu.matmul %21, %23, %cst_27 {dimension_numbers = #tpu.dot_dimension_numbers<[1], [0], [0], [1], [0, 0, 1, 1], [], []>} : vector<8x12xf32>, vector<12x32xf32>, vector<8x32xf32> -> vector<8x32xf32>
    %c0_28 = arith.constant 0 : index
    %c0_29 = arith.constant 0 : index
    %c0_30 = arith.constant 0 : index
    %25 = vector.load %arg4[%c0_28, %c0_29, %c0_30] : memref<2x1x32xf32, #tpu.memory_space<vmem>>, vector<1x1x32xf32>
    %26 = vector.shape_cast %25 : vector<1x1x32xf32> to vector<1x32xf32>
    %27 = vector.broadcast %26 : vector<1x32xf32> to vector<8x32xf32>
    %28 = arith.addf %24, %27 : vector<8x32xf32>
    %cst_31 = arith.constant 0.000000e+00 : f32
    %29 = vector.broadcast %cst_31 : f32 to vector<8x32xf32>
    %30 = arith.cmpf oge, %28, %29 : vector<8x32xf32>
    %cst_32 = arith.constant 0.00999999977 : f32
    %31 = vector.broadcast %cst_32 : f32 to vector<8x32xf32>
    %32 = arith.mulf %31, %28 : vector<8x32xf32>
    %33 = arith.select %30, %28, %32 : vector<8x32xi1>, vector<8x32xf32>
    %cst_33 = arith.constant dense<0.000000e+00> : vector<8x32xf32>
    %34 = tpu.matmul %33, %14, %cst_33 {dimension_numbers = #tpu.dot_dimension_numbers<[1], [0], [0], [1], [0, 0, 1, 1], [], []>} : vector<8x32xf32>, vector<32x32xf32>, vector<8x32xf32> -> vector<8x32xf32>
    %cst_34 = arith.constant dense<0.000000e+00> : vector<8x32xf32>
    %35 = tpu.matmul %33, %16, %cst_34 {dimension_numbers = #tpu.dot_dimension_numbers<[1], [0], [0], [1], [0, 0, 1, 1], [], []>} : vector<8x32xf32>, vector<32x32xf32>, vector<8x32xf32> -> vector<8x32xf32>
    %36 = vector.broadcast %17 : vector<1x32xf32> to vector<8x32xf32>
    %37 = arith.addf %35, %36 : vector<8x32xf32>
    %cst_35 = arith.constant 0.000000e+00 : f32
    %38 = vector.broadcast %cst_35 : f32 to vector<8x32xf32>
    %39 = arith.cmpf oge, %37, %38 : vector<8x32xf32>
    %cst_36 = arith.constant 0.00999999977 : f32
    %40 = vector.broadcast %cst_36 : f32 to vector<8x32xf32>
    %41 = arith.mulf %40, %37 : vector<8x32xf32>
    %42 = arith.select %39, %37, %41 : vector<8x32xi1>, vector<8x32xf32>
    %43 = arith.mulf %12, %34 : vector<8x32xf32>
    %cst_37 = arith.constant dense<0.000000e+00> : vector<8x4xf32>
    %44 = tpu.matmul %43, %18, %cst_37 {dimension_numbers = #tpu.dot_dimension_numbers<[1], [0], [0], [1], [0, 0, 1, 1], [], []>} : vector<8x32xf32>, vector<32x4xf32>, vector<8x4xf32> -> vector<8x4xf32>
    %c1_38 = arith.constant 1 : index
    %c0_39 = arith.constant 0 : index
    %c0_40 = arith.constant 0 : index
    %45 = vector.load %arg1[%c1_38, %c0_39, %c0_40] : memref<2x8x12xf32, #tpu.memory_space<vmem>>, vector<1x8x12xf32>
    %46 = vector.shape_cast %45 : vector<1x8x12xf32> to vector<8x12xf32>
    %c1_41 = arith.constant 1 : index
    %c0_42 = arith.constant 0 : index
    %c0_43 = arith.constant 0 : index
    %47 = vector.load %arg3[%c1_41, %c0_42, %c0_43] : memref<2x12x32xf32, #tpu.memory_space<vmem>>, vector<1x12x32xf32>
    %48 = vector.shape_cast %47 : vector<1x12x32xf32> to vector<12x32xf32>
    %cst_44 = arith.constant dense<0.000000e+00> : vector<8x32xf32>
    %49 = tpu.matmul %46, %48, %cst_44 {dimension_numbers = #tpu.dot_dimension_numbers<[1], [0], [0], [1], [0, 0, 1, 1], [], []>} : vector<8x12xf32>, vector<12x32xf32>, vector<8x32xf32> -> vector<8x32xf32>
    %c1_45 = arith.constant 1 : index
    %c0_46 = arith.constant 0 : index
    %c0_47 = arith.constant 0 : index
    %50 = vector.load %arg4[%c1_45, %c0_46, %c0_47] : memref<2x1x32xf32, #tpu.memory_space<vmem>>, vector<1x1x32xf32>
    %51 = vector.shape_cast %50 : vector<1x1x32xf32> to vector<1x32xf32>
    %52 = vector.broadcast %51 : vector<1x32xf32> to vector<8x32xf32>
    %53 = arith.addf %49, %52 : vector<8x32xf32>
    %cst_48 = arith.constant 0.000000e+00 : f32
    %54 = vector.broadcast %cst_48 : f32 to vector<8x32xf32>
    %55 = arith.cmpf oge, %53, %54 : vector<8x32xf32>
    %cst_49 = arith.constant 0.00999999977 : f32
    %56 = vector.broadcast %cst_49 : f32 to vector<8x32xf32>
    %57 = arith.mulf %56, %53 : vector<8x32xf32>
    %58 = arith.select %55, %53, %57 : vector<8x32xi1>, vector<8x32xf32>
    %cst_50 = arith.constant dense<0.000000e+00> : vector<8x32xf32>
    %59 = tpu.matmul %58, %14, %cst_50 {dimension_numbers = #tpu.dot_dimension_numbers<[1], [0], [0], [1], [0, 0, 1, 1], [], []>} : vector<8x32xf32>, vector<32x32xf32>, vector<8x32xf32> -> vector<8x32xf32>
    %cst_51 = arith.constant dense<0.000000e+00> : vector<8x32xf32>
    %60 = tpu.matmul %58, %16, %cst_51 {dimension_numbers = #tpu.dot_dimension_numbers<[1], [0], [0], [1], [0, 0, 1, 1], [], []>} : vector<8x32xf32>, vector<32x32xf32>, vector<8x32xf32> -> vector<8x32xf32>
    %61 = vector.broadcast %17 : vector<1x32xf32> to vector<8x32xf32>
    %62 = arith.addf %60, %61 : vector<8x32xf32>
    %cst_52 = arith.constant 0.000000e+00 : f32
    %63 = vector.broadcast %cst_52 : f32 to vector<8x32xf32>
    %64 = arith.cmpf oge, %62, %63 : vector<8x32xf32>
    %cst_53 = arith.constant 0.00999999977 : f32
    %65 = vector.broadcast %cst_53 : f32 to vector<8x32xf32>
    %66 = arith.mulf %65, %62 : vector<8x32xf32>
    %67 = arith.select %64, %62, %66 : vector<8x32xi1>, vector<8x32xf32>
    %68 = arith.mulf %12, %59 : vector<8x32xf32>
    %cst_54 = arith.constant dense<0.000000e+00> : vector<8x4xf32>
    %69 = tpu.matmul %68, %18, %cst_54 {dimension_numbers = #tpu.dot_dimension_numbers<[1], [0], [0], [1], [0, 0, 1, 1], [], []>} : vector<8x32xf32>, vector<32x4xf32>, vector<8x4xf32> -> vector<8x4xf32>
    %70 = arith.maximumf %44, %69 : vector<8x4xf32>
    %71 = arith.subf %44, %70 : vector<8x4xf32>
    %72 = math.exp %71 : vector<8x4xf32>
    %73 = arith.subf %69, %70 : vector<8x4xf32>
    %74 = math.exp %73 : vector<8x4xf32>
    %75 = arith.addf %72, %74 : vector<8x4xf32>
    %76 = tpu.reciprocal %75 {approx = true} : vector<8x4xf32> -> vector<8x4xf32>
    %77 = arith.mulf %72, %76 : vector<8x4xf32>
    %cst_55 = arith.constant dense<0.000000e+00> : vector<8x32xf32>
    %78 = tpu.matmul %77, %19, %cst_55 {dimension_numbers = #tpu.dot_dimension_numbers<[1], [0], [0], [1], [0, 0, 1, 1], [], []>} : vector<8x4xf32>, vector<4x32xf32>, vector<8x32xf32> -> vector<8x32xf32>
    %79 = arith.mulf %78, %42 : vector<8x32xf32>
    %80 = arith.mulf %74, %76 : vector<8x4xf32>
    %cst_56 = arith.constant dense<0.000000e+00> : vector<8x32xf32>
    %81 = tpu.matmul %80, %19, %cst_56 {dimension_numbers = #tpu.dot_dimension_numbers<[1], [0], [0], [1], [0, 0, 1, 1], [], []>} : vector<8x4xf32>, vector<4x32xf32>, vector<8x32xf32> -> vector<8x32xf32>
    %82 = arith.mulf %81, %67 : vector<8x32xf32>
    %83 = arith.addf %79, %82 : vector<8x32xf32>
    %c0_57 = arith.constant 0 : index
    %c0_58 = arith.constant 0 : index
    %84 = vector.load %arg12[%c0_57, %c0_58] : memref<96x32xf32, #tpu.memory_space<vmem>>, vector<96x32xf32>
    %cst_59 = arith.constant dense<0.000000e+00> : vector<8x32xf32>
    %85 = tpu.matmul %10, %84, %cst_59 {dimension_numbers = #tpu.dot_dimension_numbers<[1], [0], [0], [1], [0, 0, 1, 1], [], []>} : vector<8x96xf32>, vector<96x32xf32>, vector<8x32xf32> -> vector<8x32xf32>
    %c0_60 = arith.constant 0 : index
    %c0_61 = arith.constant 0 : index
    %86 = vector.load %arg13[%c0_60, %c0_61] : memref<32x32xf32, #tpu.memory_space<vmem>>, vector<32x32xf32>
    %cst_62 = arith.constant dense<0.000000e+00> : vector<8x32xf32>
    %87 = tpu.matmul %83, %86, %cst_62 {dimension_numbers = #tpu.dot_dimension_numbers<[1], [0], [0], [1], [0, 0, 1, 1], [], []>} : vector<8x32xf32>, vector<32x32xf32>, vector<8x32xf32> -> vector<8x32xf32>
    %88 = arith.addf %85, %87 : vector<8x32xf32>
    %c0_63 = arith.constant 0 : index
    %c0_64 = arith.constant 0 : index
    %89 = vector.load %arg14[%c0_63, %c0_64] : memref<1x32xf32, #tpu.memory_space<vmem>>, vector<1x32xf32>
    %90 = vector.broadcast %89 : vector<1x32xf32> to vector<8x32xf32>
    %91 = arith.addf %88, %90 : vector<8x32xf32>
    %cst_65 = arith.constant 0.000000e+00 : f32
    %92 = vector.broadcast %cst_65 : f32 to vector<8x32xf32>
    %93 = arith.cmpf oge, %91, %92 : vector<8x32xf32>
    %cst_66 = arith.constant 0.00999999977 : f32
    %94 = vector.broadcast %cst_66 : f32 to vector<8x32xf32>
    %95 = arith.mulf %94, %91 : vector<8x32xf32>
    %96 = arith.select %93, %91, %95 : vector<8x32xi1>, vector<8x32xf32>
    %c0_67 = arith.constant 0 : index
    %c0_68 = arith.constant 0 : index
    %97 = vector.load %arg15[%c0_67, %c0_68] : memref<32x4xf32, #tpu.memory_space<vmem>>, vector<32x4xf32>
    %cst_69 = arith.constant dense<0.000000e+00> : vector<8x4xf32>
    %98 = tpu.matmul %96, %97, %cst_69 {dimension_numbers = #tpu.dot_dimension_numbers<[1], [0], [0], [1], [0, 0, 1, 1], [], []>} : vector<8x32xf32>, vector<32x4xf32>, vector<8x4xf32> -> vector<8x4xf32>
    %c0_70 = arith.constant 0 : index
    %c0_71 = arith.constant 0 : index
    %99 = vector.load %arg16[%c0_70, %c0_71] : memref<1x4xf32, #tpu.memory_space<vmem>>, vector<1x4xf32>
    %100 = vector.broadcast %99 : vector<1x4xf32> to vector<8x4xf32>
    %101 = arith.addf %98, %100 : vector<8x4xf32>
    %c0_72 = arith.constant 0 : index
    %c0_73 = arith.constant 0 : index
    %102 = vector.load %arg17[%c0_72, %c0_73] : memref<8x4xf32, #tpu.memory_space<vmem>>, vector<8x4xf32>
    tpu.vector_store %arg17[%c0_72, %c0_73], %101 {strides = array<i32>} : memref<8x4xf32, #tpu.memory_space<vmem>>, vector<8x4xf32>,
    return
  }
  func.func @transform_0(%arg0: i32) -> (i32, i32, i32) {
    %c0_i32 = arith.constant 0 : i32
    %c0_i32_0 = arith.constant 0 : i32
    %c0_i32_1 = arith.constant 0 : i32
    return %c0_i32, %arg0, %c0_i32_0 : i32, i32, i32
  }
  func.func @transform_1(%arg0: i32) -> (i32, i32) {
    %c0_i32 = arith.constant 0 : i32
    %c0_i32_0 = arith.constant 0 : i32
    return %arg0, %c0_i32 : i32, i32
  }
  func.func @transform_2(%arg0: i32) -> (i32, i32, i32) {
    %c0_i32 = arith.constant 0 : i32
    %c0_i32_0 = arith.constant 0 : i32
    %c0_i32_1 = arith.constant 0 : i32
    %c0_i32_2 = arith.constant 0 : i32
    return %c0_i32, %c0_i32_0, %c0_i32_1 : i32, i32, i32
  }
  func.func @transform_3(%arg0: i32) -> (i32, i32, i32) {
    %c0_i32 = arith.constant 0 : i32
    %c0_i32_0 = arith.constant 0 : i32
    %c0_i32_1 = arith.constant 0 : i32
    %c0_i32_2 = arith.constant 0 : i32
    return %c0_i32, %c0_i32_0, %c0_i32_1 : i32, i32, i32
  }
  func.func @transform_4(%arg0: i32) -> (i32, i32) {
    %c0_i32 = arith.constant 0 : i32
    %c0_i32_0 = arith.constant 0 : i32
    %c0_i32_1 = arith.constant 0 : i32
    return %c0_i32, %c0_i32_0 : i32, i32
  }
  func.func @transform_5(%arg0: i32) -> (i32, i32) {
    %c0_i32 = arith.constant 0 : i32
    %c0_i32_0 = arith.constant 0 : i32
    %c0_i32_1 = arith.constant 0 : i32
    return %c0_i32, %c0_i32_0 : i32, i32
  }
  func.func @transform_6(%arg0: i32) -> (i32, i32) {
    %c0_i32 = arith.constant 0 : i32
    %c0_i32_0 = arith.constant 0 : i32
    %c0_i32_1 = arith.constant 0 : i32
    return %c0_i32, %c0_i32_0 : i32, i32
  }
  func.func @transform_7(%arg0: i32) -> (i32, i32, i32) {
    %c0_i32 = arith.constant 0 : i32
    %c0_i32_0 = arith.constant 0 : i32
    %c0_i32_1 = arith.constant 0 : i32
    %c0_i32_2 = arith.constant 0 : i32
    return %c0_i32, %c0_i32_0, %c0_i32_1 : i32, i32, i32
  }
  func.func @transform_8(%arg0: i32) -> (i32, i32) {
    %c0_i32 = arith.constant 0 : i32
    %c0_i32_0 = arith.constant 0 : i32
    %c0_i32_1 = arith.constant 0 : i32
    return %c0_i32, %c0_i32_0 : i32, i32
  }
  func.func @transform_9(%arg0: i32) -> (i32, i32) {
    %c0_i32 = arith.constant 0 : i32
    %c0_i32_0 = arith.constant 0 : i32
    %c0_i32_1 = arith.constant 0 : i32
    return %c0_i32, %c0_i32_0 : i32, i32
  }
  func.func @transform_10(%arg0: i32) -> (i32, i32) {
    %c0_i32 = arith.constant 0 : i32
    %c0_i32_0 = arith.constant 0 : i32
    %c0_i32_1 = arith.constant 0 : i32
    return %c0_i32, %c0_i32_0 : i32, i32
  }
  func.func @transform_11(%arg0: i32) -> (i32, i32) {
    %c0_i32 = arith.constant 0 : i32
    %c0_i32_0 = arith.constant 0 : i32
    %c0_i32_1 = arith.constant 0 : i32
    return %c0_i32, %c0_i32_0 : i32, i32
  }
  func.func @transform_12(%arg0: i32) -> (i32, i32) {
    %c0_i32 = arith.constant 0 : i32
    %c0_i32_0 = arith.constant 0 : i32
    %c0_i32_1 = arith.constant 0 : i32
    return %c0_i32, %c0_i32_0 : i32, i32
  }
  func.func @transform_13(%arg0: i32) -> (i32, i32) {
    %c0_i32 = arith.constant 0 : i32
    %c0_i32_0 = arith.constant 0 : i32
    %c0_i32_1 = arith.constant 0 : i32
    return %c0_i32, %c0_i32_0 : i32, i32
  }
  func.func @transform_14(%arg0: i32) -> (i32, i32) {
    %c0_i32 = arith.constant 0 : i32
    %c0_i32_0 = arith.constant 0 : i32
    %c0_i32_1 = arith.constant 0 : i32
    return %c0_i32, %c0_i32_0 : i32, i32
  }
  func.func @transform_15(%arg0: i32) -> (i32, i32) {
    %c0_i32 = arith.constant 0 : i32
    %c0_i32_0 = arith.constant 0 : i32
    %c0_i32_1 = arith.constant 0 : i32
    return %c0_i32, %c0_i32_0 : i32, i32
  }
  func.func @transform_16(%arg0: i32) -> (i32, i32) {
    %c0_i32 = arith.constant 0 : i32
    %c0_i32_0 = arith.constant 0 : i32
    return %arg0, %c0_i32 : i32, i32
  }
}

</mosaic_0001>

<bundles_post_ra>
// kernel: tpu_custom_call.1
= control target key start
LH: loop header
LB: loop body
LE: loop exit
PB: predicated region body
PF: predicated region fallthrough
CT: control target
= control target key end

     0   :  { %v1688_v0 = vmov 0.0|0.0   ;;  %vm1689_vm0 = vmmov 0   ;;  %v1690_v3 = vmov 0.0   ;;  %vm256_vm1 = vcmask 1043456   ;;  %s2063_s4 = inlined_call_operand.vmem [shape: f32[24,96], index: 4, kind: input, shape index: {}]   ;;  %s2064_s2 = inlined_call_operand.vmem [shape: f32[2,12,32], index: 2, kind: input, shape index: {}]   ;;  %s2065_s6 = inlined_call_operand.vmem [shape: f32[96,32], index: 6, kind: input, shape index: {}]   ;;  %s2066_s1 = inlined_call_operand.vmem [shape: f32[8,24], index: 1, kind: input, shape index: {}]   ;;  %s2067_s0 = inlined_call_operand.vmem [shape: f32[2,8,12], index: 0, kind: input, shape index: {}]   ;;  %s2068_s7 = inlined_call_operand.vmem [shape: f32[2,32,32], index: 7, kind: input, shape index: {}]   ;;  %s2069_s5 = inlined_call_operand.vmem [shape: f32[1,96], index: 5, kind: input, shape index: {}]   ;;  %s2070_s3 = inlined_call_operand.vmem [shape: f32[2,1,32], index: 3, kind: input, shape index: {}]   ;;  %s2071_s9 = inlined_call_operand.vmem [shape: f32[32,4], index: 9, kind: input, shape index: {}]   ;;  %s2072_s10 = inlined_call_operand.vmem [shape: f32[4,32], index: 10, kind: input, shape index: {}]   ;;  %s2073_s11 = inlined_call_operand.vmem [shape: f32[96,32], index: 11, kind: input, shape index: {}]   ;;  %s2074_s12 = inlined_call_operand.vmem [shape: f32[32,32], index: 12, kind: input, shape index: {}]   ;;  %s2075_s8 = inlined_call_operand.vmem [shape: f32[1,32], index: 8, kind: input, shape index: {}]   ;;  %s2076_s14 = inlined_call_operand.vmem [shape: f32[32,4], index: 14, kind: input, shape index: {}]   ;;  %s2077_s13 = inlined_call_operand.vmem [shape: f32[1,32], index: 13, kind: input, shape index: {}]   ;;  %s2078_s15 = inlined_call_operand.vmem [shape: f32[1,4], index: 15, kind: input, shape index: {}]   ;;  %s2079_s16 = inlined_call_operand.vmem [shape: f32[8,4], index: 16, kind: output, shape index: {}]  }
   0x1   :  { %2081 = sst [smem:[#allocation2_spill]] %s2063_s4  ;;  %1583 = vmatprep.subr.bf16.mxu0 %v1688_v0  ;;  %1414 = vmatprep.mubr.msk.f32.mxu0 %vm1689_vm0, %v1690_v3  ;;  %v243_v5 = vld [vmem:[%s2064_s2] sm:$0xff]  ;;  %v244_v6 = vld [vmem:[%s2064_s2 + $0x8] sm:$0xf]  ;;  %v143_v9 = vld [vmem:[%s2065_s6 + $0x10] sm:$0xff]  ;;  %vm64_vm2 = vcmask 195584  }
   0x2   :  { %s2082_s23 = sld [smem:[#allocation2_spill]]  ;;  %1586 = vmatprep.subr.bf16.mxu1 %v1688_v0  ;;  %1441 = vmatprep.mubr.msk.f32.mxu1 %vm1689_vm0, %v1690_v3  ;;  %v141_v7 = vld [vmem:[%s2065_s6] sm:$0xff]  ;;  %v142_v8 = vld [vmem:[%s2065_s6 + $0x8] sm:$0xff]  ;;  %v144_v10 = vld [vmem:[%s2065_s6 + $0x18] sm:$0xff]  ;;  %v1605_v14 = vpack.c.bf16 %v244_v6, %v243_v5  ;;  %vm1691_vm3 = vmmov 1   ;;  %vm252_vm5 = vcmask 97280  }
   0x3   :  { %v1587_v12 = vpack.c.bf16 %v142_v8, %v141_v7  ;;  %v53_v13 = vld [vmem:[%s2066_s1] sm:$0xff]  ;;  %vm1815_vm4 = vmpackc.low %vm256_vm1, %vm1691_vm3  ;;  %v1590_v16 = vpack.c.bf16 %v144_v10, %v143_v9  ;;  %v146_v18 = vld [vmem:[%s2065_s6 + $0x28] sm:$0xff]  ;;  %vm153_vm7 = vcmask 785408   ;;  %vm333_vm9 = vcmask 261120  }
   0x4   :  { %v145_v17 = vld [vmem:[%s2065_s6 + $0x20] sm:$0xff]  ;;  %v147_v21 = vld [vmem:[%s2065_s6 + $0x30] sm:$0xff]  ;;  %v148_v22 = vld [vmem:[%s2065_s6 + $0x38] sm:$0xff]  ;;  %vm882_vm11 = vcmask 31744  }
   0x5   :  { %1588 = vmatpush3.bf16.msra.mxu1 %v1587_v12  ;;  %v242_v19 = vld [vmem:[%s2067_s0] sm:$0xff]  ;;  %v1593_v20 = vpack.c.bf16 %v146_v18, %v145_v17  ;;  %v1596_v23 = vpack.c.bf16 %v148_v22, %v147_v21  ;;  %v150_v25 = vld [vmem:[%s2065_s6 + $0x48] sm:$0xff]  ;;  %v151_v30 = vld [vmem:[%s2065_s6 + $0x50] sm:$0xff] }
   0x6   :  { %1589 = vmatprep.subr.bf16.mxu1 %v1688_v0  ;;  %v149_v24 = vld [vmem:[%s2065_s6 + $0x40] sm:$0xff]  ;;  %v228_v28 = vld [vmem:[%s2068_s7 + $0x8] sm:$0xff]  ;;  %v152_v31 = vld [vmem:[%s2065_s6 + $0x58] sm:$0xff] }
   0x7   :  { %v1599_v26 = vpack.c.bf16 %v150_v25, %v149_v24  ;;  %v227_v27 = vld [vmem:[%s2068_s7] sm:$0xff]  ;;  %v1602_v32 = vpack.c.bf16 %v152_v31, %v151_v30  ;;  %v229_v33 = vld [vmem:[%s2068_s7 + $0x10] sm:$0xff]  ;;  %v230_v34 = vld [vmem:[%s2068_s7 + $0x18] sm:$0xff] }
   0x8   :  { %v54_v1 = vld [vmem:[%s2082_s23] sm:$0xff]  ;;  %v55_v2 = vld [vmem:[%s2082_s23 + $0x8] sm:$0xff]  ;;  %v56_v11 = vld [vmem:[%s2082_s23 + $0x10] sm:$0xff]  ;;  %v1609_v29 = vpack.c.bf16 %v228_v28, %v227_v27  ;;  %v1612_v35 = vpack.c.bf16 %v230_v34, %v229_v33 }
   0x9   :  { %v1584_v4 = vpack.c.bf16 %v55_v2, %v54_v1  ;;  %1591 = vmatpush3.bf16.msra.mxu1 %v1590_v16  ;;  %v1295_v36 = vld [vmem:[%s2069_s5] ss:$0 sm:$0xff]  ;;  %v1299_v44 = vld [vmem:[%s2068_s7 + $0x28] sm:$0xff]  ;;  %v1300_v50 = vld [vmem:[%s2068_s7 + $0x30] sm:$0xff] }
   0xa   :  { %1592 = vmatprep.subr.bf16.mxu1 %v1688_v0  ;;  %v1302_v40 = vld [vmem:[%s2070_s3] ss:$0 sm:$0xff]  ;;  %v1301_v51 = vld [vmem:[%s2068_s7 + $0x38] sm:$0xff]  ;;  %v1310_v54 = vld [vmem:[%s2064_s2 + $0x10] sm:$0xff] }
   0xb   :  { %1585 = vmatpush3.bf16.msra.mxu0 %v1584_v4  ;;  %v1298_v43 = vld [vmem:[%s2068_s7 + $0x20] sm:$0xff]  ;;  %v1618_v53 = vpack.c.bf16 %v1301_v51, %v1300_v50  ;;  %v1311_v55 = vld [vmem:[%s2064_s2 + $0x18] sm:$0xf]  ;;  %v1309_v57 = vld [vmem:[%s2067_s0 + $0x8] sm:$0xff] }
   0xc   :  { %1412 = vmatprep.subr.mxu0 %v1690_v3  ;;  %v1615_v49 = vpack.c.bf16 %v1299_v44, %v1298_v43  ;;  %v1627_v56 = vpack.c.bf16 %v1311_v55, %v1310_v54  ;;  %v237_v58 = vld [vmem:[%s2071_s9] sm:$0xff]  ;;  %v238_v59 = vld [vmem:[%s2071_s9 + $0x8] sm:$0xff]  ;;  %v239_v61 = vld [vmem:[%s2071_s9 + $0x10] sm:$0xff] }
   0xd   :  { %1594 = vmatpush3.bf16.msra.mxu1 %v1593_v20  ;;  %v1621_v60 = vpack.c.bf16 %v238_v59, %v237_v58  ;;  %v240_v62 = vld [vmem:[%s2071_s9 + $0x18] sm:$0xff]  ;;  %v1313_v9 = vld [vmem:[%s2070_s3 + $0x1] ss:$0 sm:$0xff]  ;;  %v1037_v34 = vld [vmem:[%s2073_s11 + $0x8] sm:$0xff] }
   0xe   :  { %1595 = vmatprep.subr.bf16.mxu1 %v1688_v0  ;;  %v1624_v63 = vpack.c.bf16 %v240_v62, %v239_v61  ;;  %v241_v22 = vld [vmem:[%s2072_s10] sm:$0xf]  ;;  %v1043_v50 = vld [vmem:[%s2073_s11 + $0x38] sm:$0xff]  ;;  %v1046_v55 = vld [vmem:[%s2073_s11 + $0x50] sm:$0xff] }
   0xf   :  { %1413 = vmatpush3.msra.mxu0 %v56_v11  ;;  %v1036_v33 = vld [vmem:[%s2073_s11] sm:$0xff]  ;;  %v1050_v58 = vld [vmem:[%s2074_s12 + $0x10] sm:$0xff]  ;;  %v1051_v59 = vld [vmem:[%s2074_s12 + $0x18] sm:$0xff] }
  0x10   :  { %1415 = vmatmul.mubr.msk.f32.vlgmr.msra.gmra.mrb[0].mxu0 %vm64_vm2, %v53_v13  ;;  %1604 = vmatprep.subr.bf16.mxu0 %v1688_v0  ;;  %v1306_v61 = vld [vmem:[%s2075_s8] ss:$0 sm:$0xff] }
  0x11   :  { %1607 = vmatpush3.bf16.msk.msra.mxu0 %vm1815_vm4, %v1605_v14  ;;  %1448 = vmatprep.mubr.msk.f32.mxu0 %vm1689_vm0, %v1690_v3 }
  0x12   :  { %1608 = vmatprep.subr.bf16.mxu0 %v1688_v0  ;;  %1597 = vmatpush3.bf16.msra.mxu1 %v1596_v23 }
  0x13   :  { %1598 = vmatprep.subr.bf16.mxu1 %v1688_v0 }
  0x14   :  { %1449 = vmatmul.mubr.msk.f32.vlgmr.msra.gmra.mrb[2].mxu0 %vm252_vm5, %v242_v19 }
  0x15   :  { %1459 = vmatprep.mubr.msk.f32.mxu0 %vm1689_vm0, %v1690_v3  ;;  %1610 = vmatpush3.bf16.msra.mxu0 %v1609_v29 }
  0x16   :  { %1600 = vmatpush3.bf16.msra.mxu1 %v1599_v26  ;;  %1611 = vmatprep.subr.bf16.mxu0 %v1688_v0 }
  0x17   :  { %1601 = vmatprep.subr.bf16.mxu1 %v1688_v0 }
  0x19   :  { %1613 = vmatpush3.bf16.msra.mxu0 %v1612_v35 }
  0x1a   :  { %1603 = vmatpush3.bf16.msra.mxu1 %v1602_v32  ;;  %1614 = vmatprep.subr.bf16.mxu0 %v1688_v0 }
  0x1b   :  { %1620 = vmatprep.subr.bf16.mxu1 %v1688_v0 }
  0xe3   :  { %v134_v37 = vpop.f32.mrb[0].mxu0 }
  0xe4   :  { %v135_v38 = vadd.f32 %v1295_v36, %v134_v37  ;;  %v1416_v39 = vpop.f32.mrb[1].mxu0  ;;  %v1049_v36 = vld [vmem:[%s2074_s12 + $0x8] sm:$0xff] }
  0xe6   :  { %vm138_vm6 = vcmp.ge.f32.partialorder %v135_v38, 0.0  ;;  %v139_v41 = vmul.f32 0.01, %v135_v38 }
  0xe7   :  { %v326_v42 = vpop.f32.mrb[2].mxu0 }
  0xe8   :  { %v327_v45 = vadd.f32 %v1302_v40, %v326_v42  ;;  %v1450_v46 = vpop.f32.mrb[3].mxu0  ;;  %v1887_v47 = vsel %vm138_vm6, %v135_v38, %v139_v41  ;;  %v1655_v38 = vpack.c.bf16 %v1037_v34, %v1036_v33  ;;  %v1038_v41 = vld [vmem:[%s2073_s11 + $0x10] sm:$0xff]  ;;  %v1039_v42 = vld [vmem:[%s2073_s11 + $0x18] sm:$0xff] }
  0xe9   :  { %1442 = vmatmul.mubr.msk.f32.vlgmr.msra.gmra.mrb[0].mxu1 %vm153_vm7, %v1887_v47  ;;  %v1658_v44 = vpack.c.bf16 %v1039_v42, %v1038_v41  ;;  %v1041_v46 = vld [vmem:[%s2073_s11 + $0x28] sm:$0xff] }
  0xea   :  { %vm330_vm8 = vcmp.ge.f32.partialorder %v327_v45, 0.0  ;;  %v331_v48 = vmul.f32 0.01, %v327_v45  ;;  %1481 = vmatprep.mubr.msk.f32.mxu1 %vm1689_vm0, %v1690_v3  ;;  %1622 = vmatpush3.bf16.msra.mxu1 %v1621_v60 }
  0xeb   :  { %1623 = vmatprep.subr.bf16.mxu1 %v1688_v0 }
  0xec   :  { %v332_v52 = vsel %vm330_vm8, %v327_v45, %v331_v48  ;;  %v1040_v45 = vld [vmem:[%s2073_s11 + $0x20] sm:$0xff] }
  0xed   :  { %1460 = vmatmul.mubr.msk.f32.vlgmr.msra.gmra.mrb[4].mxu0 %vm333_vm9, %v332_v52  ;;  %v1661_v48 = vpack.c.bf16 %v1041_v46, %v1040_v45 }
  0xee   :  { %1616 = vmatpush3.bf16.msra.mxu0 %v1615_v49  ;;  %1470 = vmatprep.mubr.msk.f32.mxu0 %vm1689_vm0, %v1690_v3 }
  0xef   :  { %1617 = vmatprep.subr.bf16.mxu0 %v1688_v0  ;;  %1625 = vmatpush3.bf16.msra.mxu1 %v1624_v63 }
  0xf0   :  { %1636 = vmatprep.subr.bf16.mxu1 %v1688_v0 }
  0xf2   :  { %1619 = vmatpush3.bf16.msra.mxu0 %v1618_v53 }
  0xf3   :  { %1626 = vmatprep.subr.bf16.mxu0 %v1688_v0 }
  0xf5   :  { %1471 = vmatmul.mubr.msk.f32.vlgmr.msra.gmra.mrb[6].mxu0 %vm333_vm9, %v332_v52  ;;  %v1044_v52 = vld [vmem:[%s2073_s11 + $0x40] sm:$0xff] }
  0xf6   :  { %1629 = vmatpush3.bf16.msk.msra.mxu0 %vm1815_vm4, %v1627_v56  ;;  %1488 = vmatprep.mubr.msk.f32.mxu0 %vm1689_vm0, %v1690_v3  ;;  %v1047_v56 = vld [vmem:[%s2073_s11 + $0x58] sm:$0xff] }
  0xf7   :  { %1630 = vmatprep.subr.bf16.mxu0 %v1688_v0 }
  0xf9   :  { %1489 = vmatmul.mubr.msk.f32.vlgmr.msra.gmra.mrb[8].mxu0 %vm252_vm5, %v1309_v57  ;;  %v1670_v57 = vpack.c.bf16 %v1047_v56, %v1046_v55 }
  0xfa   :  { %1632 = vmatpush3.bf16.msra.mxu0 %v1609_v29  ;;  %1499 = vmatprep.mubr.msk.f32.mxu0 %vm1689_vm0, %v1690_v3 }
  0xfb   :  { %1633 = vmatprep.subr.bf16.mxu0 %v1688_v0 }
  0xfe   :  { %1635 = vmatpush3.bf16.msra.mxu0 %v1612_v35  ;;  %v1048_v35 = vld [vmem:[%s2074_s12] sm:$0xff] }
  0xff   :  { %1642 = vmatprep.subr.bf16.mxu0 %v1688_v0  ;;  %v1649_v43 = vpack.c.bf16 %v1049_v36, %v1048_v35 }
 0x1bc   :  { %v223_v1 = vpop.f32.mrb[0].mxu1 }
 0x1bd   :  { %v1443_v2 = vpop.f32.mrb[1].mxu1 }
 0x1c0   :  { %v403_v4 = vpop.f32.mrb[4].mxu0 }
 0x1c1   :  { %v486_v5 = vmul.f32 %v403_v4, %v223_v1  ;;  %v1461_v6 = vpop.f32.mrb[5].mxu0 }
 0x1c3   :  { %1482 = vmatmul.mubr.msk.f32.vlgmr.msra.gmra.mrb[2].mxu1 %vm333_vm9, %v486_v5 }
 0x1c4   :  { %1638 = vmatpush3.bf16.msra.mxu1 %v1615_v49  ;;  %1510 = vmatprep.mubr.msk.f32.mxu1 %vm1689_vm0, %v1690_v3  ;;  %v1042_v49 = vld [vmem:[%s2073_s11 + $0x30] sm:$0xff] }
 0x1c5   :  { %1639 = vmatprep.subr.bf16.mxu1 %v1688_v0  ;;  %v1664_v51 = vpack.c.bf16 %v1043_v50, %v1042_v49 }
 0x1c8   :  { %v1942_v7 = vpop.f32.mrb[6].mxu0  ;;  %1641 = vmatpush3.bf16.msra.mxu1 %v1618_v53  ;;  %v1045_v53 = vld [vmem:[%s2073_s11 + $0x48] sm:$0xff] }
 0x1c9   :  { %v1472_v8 = vpop.f32.mrb[7].mxu0  ;;  %1529 = vmatprep.subr.mxu1 %v1690_v3  ;;  %v1667_v54 = vpack.c.bf16 %v1045_v53, %v1044_v52  ;;  %v480_v62 = vadd.f32 %v1306_v61, %v1942_v7 }
 0x1cb   :  { %vm483_vm12 = vcmp.ge.f32.partialorder %v480_v62, 0.0 }
 0x1cc   :  { %v645_v10 = vpop.f32.mrb[8].mxu0 }
 0x1cd   :  { %v646_v11 = vadd.f32 %v1313_v9, %v645_v10  ;;  %v1490_v12 = vpop.f32.mrb[9].mxu0 }
 0x1cf   :  { %vm649_vm10 = vcmp.ge.f32.partialorder %v646_v11, 0.0  ;;  %v650_v13 = vmul.f32 0.01, %v646_v11 }
 0x1d1   :  { %v651_v14 = vsel %vm649_vm10, %v646_v11, %v650_v13 }
 0x1d2   :  { %1500 = vmatmul.mubr.msk.f32.vlgmr.msra.gmra.mrb[10].mxu0 %vm333_vm9, %v651_v14  ;;  %1511 = vmatmul.mubr.msk.f32.vlgmr.msra.gmra.mrb[4].mxu1 %vm333_vm9, %v651_v14  ;;  %v1206_v14 = vld [vmem:[%s2076_s14] sm:$0xff] }
 0x1d3   :  { %1644 = vmatpush3.bf16.msra.mxu0 %v1621_v60  ;;  %1521 = vmatprep.mubr.msk.f32.mxu0 %vm1689_vm0, %v1690_v3  ;;  %v1652_v60 = vpack.c.bf16 %v1051_v59, %v1050_v58 }
 0x1d4   :  { %1645 = vmatprep.subr.bf16.mxu0 %v1688_v0  ;;  %1531 = vmatprep.mubr.msk.f32.mxu1 %vm1689_vm0, %v1690_v3 }
 0x1d5   :  { %1530 = vmatpush3.msk.msra.mxu1 %vm256_vm1, %v241_v22 }
 0x1d6   :  { %1654 = vmatprep.subr.bf16.mxu1 %v1688_v0 }
 0x1d7   :  { %1647 = vmatpush3.bf16.msra.mxu0 %v1624_v63  ;;  %v484_v63 = vmul.f32 0.01, %v480_v62 }
 0x1d8   :  { %1524 = vmatprep.subr.mxu0 %v1690_v3 }
 0x1d9   :  { %v485_v2 = vsel %vm483_vm12, %v480_v62, %v484_v63 }
 0x296   :  { %v556_v15 = vpop.f32.mrb[2].mxu1 }
 0x297   :  { %v1483_v16 = vpop.f32.mrb[3].mxu1 }
 0x2a5   :  { %v721_v17 = vpop.f32.mrb[10].mxu0  ;;  %v1956_v18 = vpop.f32.mrb[4].mxu1 }
 0x2a6   :  { %v798_v19 = vmul.f32 %v721_v17, %v223_v1  ;;  %v1501_v20 = vpop.f32.mrb[11].mxu0  ;;  %v1512_v21 = vpop.f32.mrb[5].mxu1  ;;  %v1208_v17 = vld [vmem:[%s2076_s14 + $0x10] sm:$0xff] }
 0x2a7   :  { %v1325_v20 = vld [vmem:[%s2077_s13] ss:$0 sm:$0xff] }
 0x2a8   :  { %1522 = vmatmul.mubr.msk.f32.vlgmr.msra.gmra.mrb[12].mxu0 %vm333_vm9, %v798_v19 }
 0x2a9   :  { %1526 = vmatprep.mubr.msk.f32.mxu0 %vm1689_vm0, %v1690_v3  ;;  %1525 = vmatpush3.msk.msra.mxu0 %vm256_vm1, %v241_v22 }
 0x2aa   :  { %1648 = vmatprep.subr.bf16.mxu0 %v1688_v0 }
 0x37b   :  { %v868_v23 = vpop.f32.mrb[12].mxu0 }
 0x37c   :  { %v872_v24 = vmax.f32 %v556_v15, %v868_v23  ;;  %v1523_v25 = vpop.f32.mrb[13].mxu0 }
 0x37d   :  { %v1326_v25 = vld [vmem:[%s2078_s15] ss:$0 sm:$0xff] }
 0x37e   :  { %v873_v26 = vsub.f32 %v556_v15, %v872_v24  ;;  %v876_v27 = vsub.f32 %v868_v23, %v872_v24  ;;  %v1207_v15 = vld [vmem:[%s2076_s14 + $0x8] sm:$0xff] }
 0x37f   :  { %v1673_v16 = vpack.c.bf16 %v1207_v15, %v1206_v14 }
 0x380   :  { %v874_v28 = vmul.f32 1.442695, %v873_v26  ;;  %v877_v29 = vmul.f32 1.442695, %v876_v27 }
 0x382   :  { %1682 = vpow2.f32 %v874_v28 }
 0x383   :  { %1684 = vpow2.f32 %v877_v29 }
 0x38c   :  { %v1683_v30 = vpop.eup %1682 }
 0x38d   :  { %v1685_v31 = vpop.eup %1684 }
 0x38e   :  { %v879_v32 = vadd.f32 %v1685_v31, %v1683_v30 }
 0x390   :  { %1686 = vrcp.f32 %v879_v32 }
 0x39a   :  { %v1687_v37 = vpop.eup %1686 }
 0x39b   :  { %v881_v39 = vmul.f32 %v1687_v37, %v1683_v30  ;;  %v960_v40 = vmul.f32 %v1687_v37, %v1685_v31 }
 0x39d   :  { %1527 = vmatmul.mubr.msk.f32.vlgmr.msra.gmra.mrb[14].mxu0 %vm882_vm11, %v881_v39  ;;  %1532 = vmatmul.mubr.msk.f32.vlgmr.msra.gmra.mrb[6].mxu1 %vm882_vm11, %v960_v40 }
 0x39e   :  { %1656 = vmatpush3.bf16.msra.mxu1 %v1655_v38  ;;  %1569 = vmatprep.mubr.msk.f32.mxu1 %vm1689_vm0, %v1690_v3 }
 0x39f   :  { %1657 = vmatprep.subr.bf16.mxu1 %v1688_v0  ;;  %1650 = vmatpush3.bf16.msra.mxu0 %v1649_v43 }
 0x3a0   :  { %1651 = vmatprep.subr.bf16.mxu0 %v1688_v0  ;;  %1542 = vmatprep.mubr.msk.f32.mxu0 %vm1689_vm0, %v1690_v3 }
 0x3a2   :  { %1659 = vmatpush3.bf16.msra.mxu1 %v1658_v44 }
 0x3a3   :  { %1660 = vmatprep.subr.bf16.mxu1 %v1688_v0  ;;  %1653 = vmatpush3.bf16.msra.mxu0 %v1652_v60 }
 0x3a4   :  { %1672 = vmatprep.subr.bf16.mxu0 %v1688_v0 }
 0x3a6   :  { %1662 = vmatpush3.bf16.msra.mxu1 %v1661_v48 }
 0x3a7   :  { %1663 = vmatprep.subr.bf16.mxu1 %v1688_v0 }
 0x3aa   :  { %1665 = vmatpush3.bf16.msra.mxu1 %v1664_v51 }
 0x3ab   :  { %1666 = vmatprep.subr.bf16.mxu1 %v1688_v0 }
 0x3ae   :  { %1668 = vmatpush3.bf16.msra.mxu1 %v1667_v54 }
 0x3af   :  { %1669 = vmatprep.subr.bf16.mxu1 %v1688_v0 }
 0x3b2   :  { %1671 = vmatpush3.bf16.msra.mxu1 %v1670_v57 }
 0x3b5   :  { %1570 = vmatmul.mubr.msk.f32.vlgmr.msra.gmra.mrb[8].mxu1 %vm153_vm7, %v1887_v47  ;;  %v792_v47 = vadd.f32 %v1306_v61, %v1956_v18 }
 0x3b7   :  { %v796_v1 = vmul.f32 0.01, %v792_v47  ;;  %vm795_vm13 = vcmp.ge.f32.partialorder %v792_v47, 0.0 }
 0x3b9   :  { %v797_v5 = vsel %vm795_vm13, %v792_v47, %v796_v1 }
 0x470   :  { %v955_v4 = vpop.f32.mrb[14].mxu0  ;;  %v1030_v6 = vpop.f32.mrb[6].mxu1 }
 0x471   :  { %v959_v8 = vmul.f32 %v955_v4, %v485_v2  ;;  %v1034_v9 = vmul.f32 %v1030_v6, %v797_v5  ;;  %v1528_v10 = vpop.f32.mrb[15].mxu0  ;;  %v1533_v11 = vpop.f32.mrb[7].mxu1 }
 0x473   :  { %v1035_v12 = vadd.f32 %v1034_v9, %v959_v8 }
 0x475   :  { %1543 = vmatmul.mubr.msk.f32.vlgmr.msra.gmra.mrb[16].mxu0 %vm333_vm9, %v1035_v12 }
 0x476   :  { %1580 = vmatprep.mubr.msk.f32.mxu0 %vm1689_vm0, %v1690_v3  ;;  %1674 = vmatpush3.bf16.msra.mxu0 %v1673_v16  ;;  %v1209_v3 = vld [vmem:[%s2076_s14 + $0x18] sm:$0xff] }
 0x477   :  { %1675 = vmatprep.subr.bf16.mxu0 %v1688_v0  ;;  %v1676_v18 = vpack.c.bf16 %v1209_v3, %v1208_v17 }
 0x47a   :  { %1677 = vmatpush3.bf16.msra.mxu0 %v1676_v18 }
 0x488   :  { %v1191_v7 = vpop.f32.mrb[8].mxu1 }
 0x489   :  { %v1571_v13 = vpop.f32.mrb[9].mxu1 }
 0x548   :  { %v1121_v19 = vpop.f32.mrb[16].mxu0 }
 0x549   :  { %v1192_v21 = vadd.f32 %v1191_v7, %v1121_v19  ;;  %v1544_v22 = vpop.f32.mrb[17].mxu0 }
 0x54b   :  { %v1202_v23 = vadd.f32 %v1325_v20, %v1192_v21 }
 0x54d   :  { %vm1203_vm14 = vcmp.ge.f32.partialorder %v1202_v23, 0.0  ;;  %v1204_v0 = vmul.f32 0.01, %v1202_v23 }
 0x54f   :  { %v1205_v24 = vsel %vm1203_vm14, %v1202_v23, %v1204_v0 }
 0x550   :  { %1581 = vmatmul.mubr.msk.f32.vlgmr.msra.gmra.mrb[18].mxu0 %vm333_vm9, %v1205_v24 }
 0x623   :  { %v1286_v26 = vpop.f32.mrb[18].mxu0 }
 0x624   :  { %v1287_v27 = vadd.f32 %v1326_v25, %v1286_v26  ;;  %v1582_v28 = vpop.f32.mrb[19].mxu0 }
 0x626   :  { %1290 = vst.msk [vmem:[%s2079_s16] sm:$0xff] %vm882_vm11, %v1287_v27 }

</bundles_post_ra>
